<compile_context>
chip_gen: v5e
topology: v5e:2x2
jax: 0.10.0
libtpu: 0.0.40
codegen_flags: <defaults>
</compile_context>

<pallas_src>
import jax
import jax.numpy as jnp
from jax.experimental import pallas as pl
from jax.experimental.pallas import tpu as pltpu


_MiB = 1024 * 1024
# Sublane packing per element size (f32 -> 8, bf16/f16 -> 16, 8-bit -> 32).
_SUBLANE = {1: 32, 2: 16, 4: 8}
_LANE_CANDIDATES = (2048, 1024, 512, 256, 128)
_HEADROOM = 8 * _MiB


def _mish_kernel(x_ref, o_ref):
    x = x_ref[...].astype(jnp.float32)
    # tanh(softplus(x)) = (t^2 + 2t) / (t^2 + 2t + 2) with t = e^x.
    # Using m = exp(-|x|) (always <= 1, never overflows):
    #   x >= 0: (1 + 2m) / (1 + 2m + 2m^2)
    #   x <  0: (m^2 + 2m) / (m^2 + 2m + 2)
    m = jnp.exp(-jnp.abs(x))
    m2 = m * m
    pos = x >= 0.0
    num = jnp.where(pos, 1.0 + 2.0 * m, m2 + 2.0 * m)
    den = num + jnp.where(pos, 2.0 * m2, 2.0)
    o_ref[...] = (x * (num / den)).astype(o_ref.dtype)


def _vmem_budget_bytes():
    """~75% of physical VMEM: ~48 MiB on v7x, ~96 MiB on v5e/v6e."""
    cap = 64 * _MiB  # conservative fallback (v7x size, legal everywhere)
    try:
        info = pltpu.get_tpu_info()
        cap = int(getattr(info, "vmem_capacity_bytes", cap))
    except Exception:
        pass
    return (cap * 3) // 4


def _run_2d(x2d, out_dtype, tile_bytes, vmem_budget):
    """Run the Mish kernel over a (rows, lanes) slab; rows % sublane_pack == 0."""
    rows, lanes = x2d.shape
    itemsize = jnp.dtype(x2d.dtype).itemsize
    sub = _SUBLANE.get(itemsize, 8)

    # ~tile_bytes per array per grid step, multiple of the sublane pack.
    tr = max(sub, (tile_bytes // (lanes * itemsize)) // sub * sub)
    if tr >= rows:
        # A single-step grid would idle one v7x TensorCore and serialize the
        # DMA/compute pipeline; split into >= 2 blocks whenever possible.
        tr = max(sub, (rows // 2) // sub * sub) if rows > sub else rows

    tile_b = tr * lanes * itemsize
    # Working set = 2 arrays x 2 buffers x tile; add headroom for internals.
    vmem_limit = int(min(vmem_budget, max(4 * tile_b + _HEADROOM, 32 * _MiB)))

    return pl.pallas_call(
        _mish_kernel,
        out_shape=jax.ShapeDtypeStruct((rows, lanes), out_dtype),
        grid=(pl.cdiv(rows, tr),),
        in_specs=[pl.BlockSpec((tr, lanes), lambda i: (i, 0))],
        out_specs=pl.BlockSpec((tr, lanes), lambda i: (i, 0)),
        compiler_params=pltpu.CompilerParams(
            dimension_semantics=("parallel",),
            vmem_limit_bytes=vmem_limit,
        ),
    )(x2d)


def mish(x, *, target_tile_bytes=None):
    """Elementwise Mish via Pallas. Accepts any shape / float dtype."""
    orig_shape, orig_dtype = x.shape, x.dtype
    n = x.size
    if n == 0:
        return x
    itemsize = jnp.dtype(orig_dtype).itemsize
    sub = _SUBLANE.get(itemsize, 8)

    vmem_budget = _vmem_budget_bytes()
    max_tile = max(512 * 1024, (vmem_budget - _HEADROOM) // 4)
    if target_tile_bytes is None:
        # 6-16 MiB tiles put every generation at ~95%+ of the HBM roofline.
        tile_bytes = max(2 * _MiB, min(16 * _MiB, max_tile))
    else:
        tile_bytes = min(int(target_tile_bytes), max_tile)

    flat = x.reshape(-1)

    # Widest lane count that tiles n exactly -> no pad / extra HBM round trips.
    lanes = None
    for cand in _LANE_CANDIDATES:
        if n % (sub * cand) == 0:
            lanes = cand
            break

    if lanes is not None:
        out2d = _run_2d(flat.reshape(n // lanes, lanes), orig_dtype,
                        tile_bytes, vmem_budget)
        return out2d.reshape(orig_shape)

    # Awkward-size fallback: main kernel on the exactly-divisible prefix,
    # a tiny padded kernel on the < sub*128-element tail. No whole-array
    # pad/slice round trip.
    lanes = 128
    chunk = sub * lanes
    n_main = (n // chunk) * chunk
    pieces = []
    if n_main:
        main2d = _run_2d(flat[:n_main].reshape(n_main // lanes, lanes),
                         orig_dtype, tile_bytes, vmem_budget)
        pieces.append(main2d.reshape(-1))
    tail_len = n - n_main
    tail = jnp.pad(flat[n_main:], (0, chunk - tail_len)).reshape(sub, lanes)
    tail_out = _run_2d(tail, orig_dtype, tile_bytes,
                       vmem_budget).reshape(-1)[:tail_len]
    pieces.append(tail_out)
    # TODO(synk): the concatenate re-writes the full output once for this rare
    # awkward-size path; folding the tail into the main call would remove it.
    out = jnp.concatenate(pieces) if len(pieces) > 1 else pieces[0]
    return out.reshape(orig_shape)


def mish_ref(x):
    x32 = x.astype(jnp.float32)
    sp = jnp.maximum(x32, 0.0) + jnp.log1p(jnp.exp(-jnp.abs(x32)))
    return (x32 * jnp.tanh(sp)).astype(x.dtype)


if __name__ == "__main__":
    key = jax.random.PRNGKey(0)

    # 1) Primary case: NCHW conv-style activation, exactly divisible slab.
    x = jax.random.normal(key, (2, 4, 16, 16), dtype=jnp.float32) * 3.0
    y = mish(x)
    jax.block_until_ready(y)
    assert y.shape == x.shape and y.dtype == x.dtype
    assert jnp.allclose(y, mish_ref(x), atol=1e-5, rtol=1e-5)

    # 2) Awkward size: exercises the prefix + tiny-tail fallback (no full pad).
    k2 = jax.random.PRNGKey(1)
    x2 = jax.random.normal(k2, (3, 5, 7, 11), dtype=jnp.float32) * 3.0
    y2 = mish(x2)
    jax.block_until_ready(y2)
    assert jnp.allclose(y2, mish_ref(x2), atol=1e-5, rtol=1e-5)

    # 3) Multi-step grid with a ragged final row-block (rows % tr != 0).
    k3 = jax.random.PRNGKey(2)
    x3 = jax.random.normal(k3, (2, 4, 40, 16), dtype=jnp.float32) * 3.0
    y3 = mish(x3, target_tile_bytes=8192)  # forces tr=16 rows, grid=3 steps
    jax.block_until_ready(y3)
    assert jnp.allclose(y3, mish_ref(x3), atol=1e-5, rtol=1e-5)

    print("KERNEL_OK")
</pallas_src>

<mosaic_0001>
module attributes {stable_mosaic.version = 11 : i64} {
  func.func @_mish_kernel(%arg0: i32, %arg1: memref<8x256xf32, #tpu.memory_space<vmem>>, %arg2: memref<8x256xf32, #tpu.memory_space<vmem>>) attributes {dimension_semantics = [#tpu.dimension_semantics<parallel>], iteration_bounds = array<i64: 1>, scalar_prefetch = 0 : i64, scratch_operands = 0 : i64, tpu.core_type = #tpu.core_type<tc>, window_params = [{transform_indices = @transform_0, window_bounds = array<i64: 8, 256>}, {transform_indices = @transform_1, window_bounds = array<i64: 8, 256>}]} {
    %c0 = arith.constant 0 : index
    %c0_0 = arith.constant 0 : index
    %0 = vector.load %arg1[%c0, %c0_0] : memref<8x256xf32, #tpu.memory_space<vmem>>, vector<8x256xf32>
    %1 = math.absf %0 : vector<8x256xf32>
    %cst = arith.constant 0.000000e+00 : f32
    %2 = vector.broadcast %cst : f32 to vector<8x256xf32>
    %3 = arith.subf %2, %1 : vector<8x256xf32>
    %4 = math.exp %3 : vector<8x256xf32>
    %5 = arith.mulf %4, %4 : vector<8x256xf32>
    %cst_1 = arith.constant 0.000000e+00 : f32
    %6 = vector.broadcast %cst_1 : f32 to vector<8x256xf32>
    %7 = arith.cmpf oge, %0, %6 : vector<8x256xf32>
    %cst_2 = arith.constant 2.000000e+00 : f32
    %8 = vector.broadcast %cst_2 : f32 to vector<8x256xf32>
    %9 = arith.mulf %8, %4 : vector<8x256xf32>
    %cst_3 = arith.constant 1.000000e+00 : f32
    %10 = vector.broadcast %cst_3 : f32 to vector<8x256xf32>
    %11 = arith.addf %10, %9 : vector<8x256xf32>
    %cst_4 = arith.constant 2.000000e+00 : f32
    %12 = vector.broadcast %cst_4 : f32 to vector<8x256xf32>
    %13 = arith.mulf %12, %4 : vector<8x256xf32>
    %14 = arith.addf %5, %13 : vector<8x256xf32>
    %15 = arith.select %7, %11, %14 : vector<8x256xi1>, vector<8x256xf32>
    %cst_5 = arith.constant 2.000000e+00 : f32
    %16 = vector.broadcast %cst_5 : f32 to vector<8x256xf32>
    %17 = arith.mulf %16, %5 : vector<8x256xf32>
    %cst_6 = arith.constant 2.000000e+00 : f32
    %18 = vector.broadcast %cst_6 : f32 to vector<8x256xf32>
    %19 = arith.select %7, %17, %18 : vector<8x256xi1>, vector<8x256xf32>
    %20 = arith.addf %15, %19 : vector<8x256xf32>
    %21 = arith.divf %15, %20 : vector<8x256xf32>
    %22 = arith.mulf %0, %21 : vector<8x256xf32>
    %c0_7 = arith.constant 0 : index
    %c0_8 = arith.constant 0 : index
    %23 = vector.load %arg2[%c0_7, %c0_8] : memref<8x256xf32, #tpu.memory_space<vmem>>, vector<8x256xf32>
    tpu.vector_store %arg2[%c0_7, %c0_8], %22 {strides = array<i32>} : memref<8x256xf32, #tpu.memory_space<vmem>>, vector<8x256xf32>,
    return
  }
  func.func @transform_0(%arg0: i32) -> (i32, i32) {
    %c0_i32 = arith.constant 0 : i32
    %c0_i32_0 = arith.constant 0 : i32
    return %arg0, %c0_i32 : i32, i32
  }
  func.func @transform_1(%arg0: i32) -> (i32, i32) {
    %c0_i32 = arith.constant 0 : i32
    %c0_i32_0 = arith.constant 0 : i32
    return %arg0, %c0_i32 : i32, i32
  }
}

</mosaic_0001>

<bundles_post_ra>
// kernel: tpu_custom_call.1
= control target key start
LH: loop header
LB: loop body
LE: loop exit
PB: predicated region body
PF: predicated region fallthrough
CT: control target
= control target key end

     0   :  { %6 = vsyncpa [#allocation3], 0  ;;  %s192_s0 = inlined_call_operand.hbm [shape: f32[8,256], index: 0, kind: input, shape index: {}]   ;;  %s193_s1 = inlined_call_operand.hbm [shape: f32[8,256], index: 1, kind: output, shape index: {}]  }
   0x1   :  { %7 = vsyncpa [#allocation4], 0  ;;  %s13_s8 = sshll.u32 %s192_s0, 4  ;;  %s164_s9 = smov [#allocation2]   ;;  %s14_s8 = int_to_ptr.hbm [resolvable:$true] %s13_s8 }
   0x2   :  { %s15_s10 = sshll.u32 %s164_s9, 4  ;;  %s16_s10 = int_to_ptr.vmem [resolvable:$true] %s15_s10 }
   0x3   :  { %18 = dma.hbm_to_vmem [thread:$0]  %s14_s8, 256, %s16_s10, [#allocation3]  }
   0x4   :  { %160 = dma.done.wait [#allocation3], 256  }
   0x5   :  { %161 = vsyncadd [#allocation3], 4294967040  ;;  %v179_v0 = vld [vmem:[#allocation2] sm:$0xff]  ;;  %v181_v1 = vld [vmem:[#allocation2 + $0x8] sm:$0xff]  ;;  %s165_s0 = smov [#allocation5]   ;;  %s92_s14 = sshll.u32 %s193_s1, 4  ;;  %s93_s14 = int_to_ptr.hbm [resolvable:$true] %s92_s14 }
   0x6   :  { %v25_v2 = vand.u32 2147483647, %v179_v0  ;;  %v26_v3 = vand.u32 2147483647, %v181_v1  ;;  %vm35_vm0 = vcmp.ge.f32.partialorder %v179_v0, 0.0  ;;  %vm36_vm1 = vcmp.ge.f32.partialorder %v181_v1, 0.0 }
   0x7   :  { %s90_s11 = sshll.u32 %s165_s0, 4  ;;  %s91_s11 = int_to_ptr.vmem [resolvable:$true] %s90_s11 }
   0x8   :  { %v27_v4 = vsub.f32 0.0, %v25_v2  ;;  %v28_v5 = vsub.f32 0.0, %v26_v3 }
   0xa   :  { %v29_v6 = vmul.f32 1.442695, %v27_v4  ;;  %v31_v7 = vmul.f32 1.442695, %v28_v5 }
   0xc   :  { %104 = vpow2.f32 %v29_v6 }
   0xd   :  { %106 = vpow2.f32 %v31_v7 }
  0x12   :  { %v105_v8 = vpop.eup %104 }
  0x13   :  { %v107_v9 = vpop.eup %106  ;;  %v33_v10 = vmul.f32 %v105_v8, %v105_v8  ;;  %v37_v11 = vmul.f32 2.0, %v105_v8 }
  0x14   :  { %v34_v12 = vmul.f32 %v107_v9, %v107_v9  ;;  %v38_v13 = vmul.f32 2.0, %v107_v9 }
  0x15   :  { %v39_v14 = vadd.f32 1.0, %v37_v11  ;;  %v41_v15 = vadd.f32 %v37_v11, %v33_v10  ;;  %v45_v16 = vmul.f32 2.0, %v33_v10 }
  0x16   :  { %v40_v17 = vadd.f32 1.0, %v38_v13  ;;  %v42_v18 = vadd.f32 %v38_v13, %v34_v12  ;;  %v46_v19 = vmul.f32 2.0, %v34_v12 }
  0x17   :  { %v43_v20 = vsel %vm35_vm0, %v39_v14, %v41_v15  ;;  %v47_v21 = vsel %vm35_vm0, %v45_v16, 2.0 }
  0x18   :  { %v49_v22 = vadd.f32 %v47_v21, %v43_v20  ;;  %v44_v23 = vsel %vm36_vm1, %v40_v17, %v42_v18  ;;  %v48_v24 = vsel %vm36_vm1, %v46_v19, 2.0 }
  0x19   :  { %v50_v25 = vadd.f32 %v48_v24, %v44_v23 }
  0x1a   :  { %108 = vrcp.f32 %v49_v22  ;;  %vm56_vm2 = vweird.f32 %v49_v22  ;;  %v62_v29 = vand.u32 2147483648, %v49_v22  ;;  %v60_v32 = vand.u32 2147483647, %v49_v22 }
  0x1b   :  { %110 = vrcp.f32 %v50_v25  ;;  %v77_v33 = vand.u32 2147483648, %v50_v25  ;;  %vm71_vm4 = vweird.f32 %v50_v25  ;;  %v75_v35 = vand.u32 2147483647, %v50_v25 }
  0x1c   :  { %v63_v37 = vor.u32 1.1754944e-38, %v62_v29  ;;  %vm61_vm7 = vcmp.eq.f32.partialorder %v60_v32, 8.507059e+37 }
  0x1d   :  { %v78_v40 = vor.u32 1.1754944e-38, %v77_v33  ;;  %vm76_vm9 = vcmp.eq.f32.partialorder %v75_v35, 8.507059e+37 }
  0x20   :  { %v109_v26 = vpop.eup %108 }
  0x21   :  { %v111_v27 = vpop.eup %110  ;;  %v52_v28 = vmul.f32 %v109_v26, %v49_v22  ;;  %vm57_vm3 = vweird.f32 %v109_v26 }
  0x22   :  { %v67_v30 = vmul.f32 %v111_v27, %v50_v25  ;;  %vm72_vm5 = vweird.f32 %v111_v27  ;;  %vm58_vm6 = vmor %vm56_vm2, %vm57_vm3 }
  0x23   :  { %v53_v31 = vsub.f32 1.0, %v52_v28  ;;  %vm73_vm8 = vmor %vm71_vm4, %vm72_vm5 }
  0x24   :  { %v68_v34 = vsub.f32 1.0, %v67_v30 }
  0x25   :  { %v54_v36 = vmul.f32 %v109_v26, %v53_v31 }
  0x26   :  { %v69_v38 = vmul.f32 %v111_v27, %v68_v34 }
  0x27   :  { %v55_v39 = vadd.f32 %v109_v26, %v54_v36 }
  0x28   :  { %v70_v41 = vadd.f32 %v111_v27, %v69_v38 }
  0x29   :  { %v59_v42 = vsel %vm58_vm6, %v109_v26, %v55_v39 }
  0x2a   :  { %v64_v43 = vsel %vm61_vm7, %v63_v37, %v59_v42  ;;  %v74_v44 = vsel %vm73_vm8, %v111_v27, %v70_v41 }
  0x2b   :  { %v65_v45 = vmul.f32 %v64_v43, %v43_v20  ;;  %v79_v46 = vsel %vm76_vm9, %v78_v40, %v74_v44 }
  0x2c   :  { %v80_v47 = vmul.f32 %v79_v46, %v44_v23 }
  0x2d   :  { %v81_v48 = vmul.f32 %v65_v45, %v179_v0 }
  0x2e   :  { %v82_v49 = vmul.f32 %v80_v47, %v181_v1 }
  0x2f   :  { %83 = vst [vmem:[#allocation5] sm:$0xff] %v81_v48 }
  0x30   :  { %84 = vst [vmem:[#allocation5 + $0x8] sm:$0xff] %v82_v49 }
  0x31   :  { %95 = dma.vmem_to_hbm [thread:$0]  %s91_s11, 256, %s93_s14, [#allocation4]  }
  0x32   :  { %162 = dma.done.wait [#allocation4], 256  }
  0x33   :  { %163 = vsyncadd [#allocation4], 4294967040 }
  0x34   :  { %100 = vsyncpa [#allocation3], 1 }
  0x35   :  { %101 = vsyncpa [#allocation4], 1 }

</bundles_post_ra>
